<compile_context>
chip_gen: v6e
topology: v6e:2x2x1
jax: 0.10.0
libtpu: 0.0.40
codegen_flags: <defaults>
</compile_context>

<pallas_src>
import functools

import jax
import jax.numpy as jnp
from jax.experimental import pallas as pl
from jax.experimental.pallas import tpu as pltpu


def _lc2d_fused_kernel(xp_ref, w_ref, o_ref, *, KH, KW, C, CC, OW,
                       ROW_TILE, N_ROW_TILES):
    # xp_ref: (1, C, H+2, W+2)                 whole padded input, one batch element
    # w_ref : (K2, O_TILE, C, ROW_TILE, OW)    per-location weight tile
    # o_ref : (1, O_TILE, ROW_TILE, OW)
    o_tile = o_ref.shape[1]

    # Output-row offset of this tile inside the padded input.  When there is a
    # single row tile (small problems) this is a plain Python 0 -> fully static
    # slices below.
    row0 = 0 if N_ROW_TILES == 1 else pl.program_id(1) * ROW_TILE

    acc = jnp.zeros((o_tile, ROW_TILE, OW), jnp.float32)
    for kh in range(KH):
        # ROW_TILE consecutive padded-input rows, full width (sublane slice only).
        rows = xp_ref[0, :, pl.ds(row0 + kh, ROW_TILE), :].astype(jnp.float32)
        for kw in range(KW):
            # Shifted window for kernel tap (kh, kw): static lane-offset slice.
            win = rows[:, :, kw:kw + OW]              # (C, ROW_TILE, OW)
            k = kh * KW + kw
            # Chunked multiply-accumulate over input channels: live temporary is
            # only (O_TILE, CC, ROW_TILE, OW); the reduction is over a leading
            # axis -> plain VPU adds (no XLU cross-sublane reduce).
            for c0 in range(0, C, CC):
                cc = min(CC, C - c0)
                wk = w_ref[k, :, c0:c0 + cc, :, :].astype(jnp.float32)
                acc = acc + jnp.sum(wk * win[c0:c0 + cc][None], axis=1)

    o_ref[0] = acc.astype(o_ref.dtype)


def _pick_tiles(O, C, K2, OH, OW, itemsize, weight_block_budget=4 * 1024 * 1024):
    """Choose (O_TILE, ROW_TILE) so a weight block fits comfortably in VMEM.

    ROW_TILE must equal OH or be a multiple of 8 (TPU sublane constraint on the
    second-to-last block dim).  Prefer the largest row tile, then the largest
    O tile, that fits the budget (double buffering is covered by the VMEM limit)."""
    row_opts = [d for d in range(OH, 0, -1) if OH % d == 0 and (d == OH or d % 8 == 0)]
    o_opts = [d for d in range(O, 0, -1) if O % d == 0]
    for rt in row_opts:
        for ot in o_opts:
            if ot * C * K2 * rt * OW * itemsize <= weight_block_budget:
                return ot, rt
    return o_opts[-1], row_opts[-1]


def prepare_weight(weight):
    """Torch-layout weight (1, O, C, OH, OW, K2) -> kernel layout (K2, O, C, OH, OW).

    Call once at setup (outside the jitted forward) so the weight transpose — the
    largest tensor here — is not re-materialized on every call."""
    return jnp.transpose(weight[0], (4, 0, 1, 2, 3))


@functools.partial(jax.jit, static_argnames=("kernel_size", "stride"))
def locally_connected_2d(x, w_t, bias=None, *, kernel_size=3, stride=1):
    """x: (N, C, H, W); w_t: prepare_weight() output (K2, O, C, OH, OW);
    bias: (1, O, OH, OW) or None."""
    if stride != 1:
        # TODO(synk): general stride needs strided in-kernel row/col windows.
        raise NotImplementedError("fused Pallas LocallyConnected2d supports stride=1")

    N, C, H, W = x.shape
    K2, O, C_w, OH, OW = w_t.shape
    KH = KW = kernel_size
    assert C_w == C and K2 == KH * KW
    assert OH == (H + 2 - KH) // stride + 1
    assert OW == (W + 2 - KW) // stride + 1

    # Only wrapper-side data movement: the padded copy (~1.3x of the small input).
    xp = jnp.pad(x, ((0, 0), (0, 0), (1, 1), (1, 1)))
    HP, WP = H + 2, W + 2

    itemsize = jnp.dtype(x.dtype).itemsize
    o_tile, row_tile = _pick_tiles(O, C, K2, OH, OW, itemsize)
    n_o_tiles, n_row_tiles = O // o_tile, OH // row_tile
    cc = min(C, 8)

    kernel = functools.partial(
        _lc2d_fused_kernel,
        KH=KH, KW=KW, C=C, CC=cc, OW=OW,
        ROW_TILE=row_tile, N_ROW_TILES=n_row_tiles)

    out = pl.pallas_call(
        kernel,
        out_shape=jax.ShapeDtypeStruct((N, O, OH, OW), x.dtype),
        grid_spec=pltpu.PrefetchScalarGridSpec(
            num_scalar_prefetch=0,
            # Batch innermost: each (large) weight tile is fetched exactly once;
            # only the small padded input block is re-fetched per step.
            grid=(n_o_tiles, n_row_tiles, N),
            in_specs=[
                pl.BlockSpec((1, C, HP, WP),
                             lambda ot, rt, n: (n, 0, 0, 0)),
                pl.BlockSpec((K2, o_tile, C, row_tile, OW),
                             lambda ot, rt, n: (0, ot, 0, rt, 0)),
            ],
            out_specs=pl.BlockSpec((1, o_tile, row_tile, OW),
                                   lambda ot, rt, n: (n, ot, rt, 0)),
        ),
        compiler_params=pltpu.CompilerParams(
            # No cross-step reduction -> every grid axis is independent
            # (lets v7x megacore shard any of them).
            dimension_semantics=("parallel", "parallel", "parallel"),
            # Explicit scoped-VMEM limit: fits v7x (64 MiB physical) with headroom;
            # raise it (and the weight-block budget) on v5e/v6e for bigger tiles.
            vmem_limit_bytes=32 * 1024 * 1024,
        ),
    )(xp, w_t)

    if bias is not None:
        out = out + bias   # (1, O, OH, OW) broadcast over batch (glue)
    return out


def make_weight(in_channels, out_channels, output_size, kernel_size):
    """Deterministic init matching the PyTorch module __init__."""
    K2 = kernel_size ** 2
    w = jnp.zeros(
        (1, out_channels, in_channels, output_size, output_size, K2),
        dtype=jnp.float32,
    )
    # weight[0, 0, :, f, f2, 8] = 1 for all spatial positions (out-channel 0 only)
    w = w.at[0, 0, :, :, :, 8].set(1.0)
    return w


def _reference(x, weight, bias, kernel_size, stride):
    """Pure-JAX reference mirroring the PyTorch forward, for validation."""
    N, C, H, W = x.shape
    _, O, _, OH, OW, K2 = weight.shape
    kh = kw = kernel_size
    dh = dw = stride
    xp = jnp.pad(x, ((0, 0), (0, 0), (1, 1), (1, 1)))
    plist = []
    for i in range(kh):
        for j in range(kw):
            plist.append(xp[:, :, i:i + dh * (OH - 1) + 1:dh, j:j + dw * (OW - 1) + 1:dw])
    patches = jnp.stack(plist, axis=-1)                       # (N, C, OH, OW, K2)
    out = jnp.sum(patches[:, None] * weight, axis=(2, -1))    # (N, O, OH, OW)
    if bias is not None:
        out = out + bias
    return out


if __name__ == "__main__":
    # Small shapes consistent with the module: kernel_size=3, stride=1, pad=1
    # => output_size == input spatial size.
    N, C, H, W = 2, 4, 16, 16
    out_channels = 2
    kernel_size = 3
    stride = 1
    output_size = (H + 2 - kernel_size) // stride + 1   # = 16

    key = jax.random.PRNGKey(0)
    x = jax.random.normal(key, (N, C, H, W), dtype=jnp.float32)

    weight = make_weight(C, out_channels, output_size, kernel_size)
    bias = None   # module default: bias=False

    # One-time weight re-layout (hoisted out of the per-call forward path).
    w_t = prepare_weight(weight)

    out = locally_connected_2d(
        x, w_t, bias, kernel_size=kernel_size, stride=stride
    )
    out = jax.block_until_ready(out)

    ref = _reference(x, weight, bias, kernel_size, stride)
    assert out.shape == (N, out_channels, output_size, output_size)
    assert jnp.allclose(out, ref, atol=1e-5, rtol=1e-5), "mismatch vs reference"

    print("KERNEL_OK")
</pallas_src>

<mosaic_0001>
module attributes {stable_mosaic.version = 11 : i64} {
  func.func @_lc2d_fused_kernel(%arg0: i32, %arg1: i32, %arg2: i32, %arg3: memref<1x4x18x18xf32, #tpu.memory_space<vmem>>, %arg4: memref<9x2x4x16x16xf32, #tpu.memory_space<vmem>>, %arg5: memref<1x2x16x16xf32, #tpu.memory_space<vmem>>) attributes {dimension_semantics = [#tpu.dimension_semantics<parallel>, #tpu.dimension_semantics<parallel>, #tpu.dimension_semantics<parallel>], iteration_bounds = array<i64: 1, 1, 2>, scalar_prefetch = 0 : i64, scratch_operands = 0 : i64, tpu.core_type = #tpu.core_type<tc>, window_params = [{transform_indices = @transform_0, window_bounds = array<i64: 1, 4, 18, 18>}, {transform_indices = @transform_1, window_bounds = array<i64: 9, 2, 4, 16, 16>}, {transform_indices = @transform_2, window_bounds = array<i64: 1, 2, 16, 16>}]} {
    %cst = arith.constant 0.000000e+00 : f32
    %0 = vector.broadcast %cst : f32 to vector<2x16x16xf32>
    %c0 = arith.constant 0 : index
    %c0_0 = arith.constant 0 : index
    %c0_1 = arith.constant 0 : index
    %c0_2 = arith.constant 0 : index
    %1 = vector.load %arg3[%c0, %c0_0, %c0_1, %c0_2] : memref<1x4x18x18xf32, #tpu.memory_space<vmem>>, vector<1x4x16x18xf32>
    %2 = vector.shape_cast %1 : vector<1x4x16x18xf32> to vector<4x16x18xf32>
    %3 = vector.extract_strided_slice %2 {offsets = [0, 0, 0], sizes = [4, 16, 16], strides = [1, 1, 1]} : vector<4x16x18xf32> to vector<4x16x16xf32>
    %c0_3 = arith.constant 0 : index
    %c0_4 = arith.constant 0 : index
    %c0_5 = arith.constant 0 : index
    %c0_6 = arith.constant 0 : index
    %c0_7 = arith.constant 0 : index
    %4 = vector.load %arg4[%c0_3, %c0_4, %c0_5, %c0_6, %c0_7] : memref<9x2x4x16x16xf32, #tpu.memory_space<vmem>>, vector<1x2x4x16x16xf32>
    %5 = vector.shape_cast %4 : vector<1x2x4x16x16xf32> to vector<2x4x16x16xf32>
    %6 = vector.shape_cast %3 : vector<4x16x16xf32> to vector<1x4x16x16xf32>
    %7 = vector.broadcast %6 : vector<1x4x16x16xf32> to vector<2x4x16x16xf32>
    %8 = arith.mulf %5, %7 : vector<2x4x16x16xf32>
    %cst_8 = arith.constant dense<0.000000e+00> : vector<2x16x16xf32>
    %9 = vector.multi_reduction <add>, %8, %cst_8 [1] : vector<2x4x16x16xf32> to vector<2x16x16xf32>
    %10 = arith.addf %0, %9 : vector<2x16x16xf32>
    %11 = vector.extract_strided_slice %2 {offsets = [0, 0, 1], sizes = [4, 16, 16], strides = [1, 1, 1]} : vector<4x16x18xf32> to vector<4x16x16xf32>
    %c1 = arith.constant 1 : index
    %c0_9 = arith.constant 0 : index
    %c0_10 = arith.constant 0 : index
    %c0_11 = arith.constant 0 : index
    %c0_12 = arith.constant 0 : index
    %12 = vector.load %arg4[%c1, %c0_9, %c0_10, %c0_11, %c0_12] : memref<9x2x4x16x16xf32, #tpu.memory_space<vmem>>, vector<1x2x4x16x16xf32>
    %13 = vector.shape_cast %12 : vector<1x2x4x16x16xf32> to vector<2x4x16x16xf32>
    %14 = vector.shape_cast %11 : vector<4x16x16xf32> to vector<1x4x16x16xf32>
    %15 = vector.broadcast %14 : vector<1x4x16x16xf32> to vector<2x4x16x16xf32>
    %16 = arith.mulf %13, %15 : vector<2x4x16x16xf32>
    %cst_13 = arith.constant dense<0.000000e+00> : vector<2x16x16xf32>
    %17 = vector.multi_reduction <add>, %16, %cst_13 [1] : vector<2x4x16x16xf32> to vector<2x16x16xf32>
    %18 = arith.addf %10, %17 : vector<2x16x16xf32>
    %19 = vector.extract_strided_slice %2 {offsets = [0, 0, 2], sizes = [4, 16, 16], strides = [1, 1, 1]} : vector<4x16x18xf32> to vector<4x16x16xf32>
    %c2 = arith.constant 2 : index
    %c0_14 = arith.constant 0 : index
    %c0_15 = arith.constant 0 : index
    %c0_16 = arith.constant 0 : index
    %c0_17 = arith.constant 0 : index
    %20 = vector.load %arg4[%c2, %c0_14, %c0_15, %c0_16, %c0_17] : memref<9x2x4x16x16xf32, #tpu.memory_space<vmem>>, vector<1x2x4x16x16xf32>
    %21 = vector.shape_cast %20 : vector<1x2x4x16x16xf32> to vector<2x4x16x16xf32>
    %22 = vector.shape_cast %19 : vector<4x16x16xf32> to vector<1x4x16x16xf32>
    %23 = vector.broadcast %22 : vector<1x4x16x16xf32> to vector<2x4x16x16xf32>
    %24 = arith.mulf %21, %23 : vector<2x4x16x16xf32>
    %cst_18 = arith.constant dense<0.000000e+00> : vector<2x16x16xf32>
    %25 = vector.multi_reduction <add>, %24, %cst_18 [1] : vector<2x4x16x16xf32> to vector<2x16x16xf32>
    %26 = arith.addf %18, %25 : vector<2x16x16xf32>
    %c0_19 = arith.constant 0 : index
    %c0_20 = arith.constant 0 : index
    %c1_21 = arith.constant 1 : index
    %c0_22 = arith.constant 0 : index
    %27 = vector.load %arg3[%c0_19, %c0_20, %c1_21, %c0_22] : memref<1x4x18x18xf32, #tpu.memory_space<vmem>>, vector<1x4x16x18xf32>
    %28 = vector.shape_cast %27 : vector<1x4x16x18xf32> to vector<4x16x18xf32>
    %29 = vector.extract_strided_slice %28 {offsets = [0, 0, 0], sizes = [4, 16, 16], strides = [1, 1, 1]} : vector<4x16x18xf32> to vector<4x16x16xf32>
    %c3 = arith.constant 3 : index
    %c0_23 = arith.constant 0 : index
    %c0_24 = arith.constant 0 : index
    %c0_25 = arith.constant 0 : index
    %c0_26 = arith.constant 0 : index
    %30 = vector.load %arg4[%c3, %c0_23, %c0_24, %c0_25, %c0_26] : memref<9x2x4x16x16xf32, #tpu.memory_space<vmem>>, vector<1x2x4x16x16xf32>
    %31 = vector.shape_cast %30 : vector<1x2x4x16x16xf32> to vector<2x4x16x16xf32>
    %32 = vector.shape_cast %29 : vector<4x16x16xf32> to vector<1x4x16x16xf32>
    %33 = vector.broadcast %32 : vector<1x4x16x16xf32> to vector<2x4x16x16xf32>
    %34 = arith.mulf %31, %33 : vector<2x4x16x16xf32>
    %cst_27 = arith.constant dense<0.000000e+00> : vector<2x16x16xf32>
    %35 = vector.multi_reduction <add>, %34, %cst_27 [1] : vector<2x4x16x16xf32> to vector<2x16x16xf32>
    %36 = arith.addf %26, %35 : vector<2x16x16xf32>
    %37 = vector.extract_strided_slice %28 {offsets = [0, 0, 1], sizes = [4, 16, 16], strides = [1, 1, 1]} : vector<4x16x18xf32> to vector<4x16x16xf32>
    %c4 = arith.constant 4 : index
    %c0_28 = arith.constant 0 : index
    %c0_29 = arith.constant 0 : index
    %c0_30 = arith.constant 0 : index
    %c0_31 = arith.constant 0 : index
    %38 = vector.load %arg4[%c4, %c0_28, %c0_29, %c0_30, %c0_31] : memref<9x2x4x16x16xf32, #tpu.memory_space<vmem>>, vector<1x2x4x16x16xf32>
    %39 = vector.shape_cast %38 : vector<1x2x4x16x16xf32> to vector<2x4x16x16xf32>
    %40 = vector.shape_cast %37 : vector<4x16x16xf32> to vector<1x4x16x16xf32>
    %41 = vector.broadcast %40 : vector<1x4x16x16xf32> to vector<2x4x16x16xf32>
    %42 = arith.mulf %39, %41 : vector<2x4x16x16xf32>
    %cst_32 = arith.constant dense<0.000000e+00> : vector<2x16x16xf32>
    %43 = vector.multi_reduction <add>, %42, %cst_32 [1] : vector<2x4x16x16xf32> to vector<2x16x16xf32>
    %44 = arith.addf %36, %43 : vector<2x16x16xf32>
    %45 = vector.extract_strided_slice %28 {offsets = [0, 0, 2], sizes = [4, 16, 16], strides = [1, 1, 1]} : vector<4x16x18xf32> to vector<4x16x16xf32>
    %c5 = arith.constant 5 : index
    %c0_33 = arith.constant 0 : index
    %c0_34 = arith.constant 0 : index
    %c0_35 = arith.constant 0 : index
    %c0_36 = arith.constant 0 : index
    %46 = vector.load %arg4[%c5, %c0_33, %c0_34, %c0_35, %c0_36] : memref<9x2x4x16x16xf32, #tpu.memory_space<vmem>>, vector<1x2x4x16x16xf32>
    %47 = vector.shape_cast %46 : vector<1x2x4x16x16xf32> to vector<2x4x16x16xf32>
    %48 = vector.shape_cast %45 : vector<4x16x16xf32> to vector<1x4x16x16xf32>
    %49 = vector.broadcast %48 : vector<1x4x16x16xf32> to vector<2x4x16x16xf32>
    %50 = arith.mulf %47, %49 : vector<2x4x16x16xf32>
    %cst_37 = arith.constant dense<0.000000e+00> : vector<2x16x16xf32>
    %51 = vector.multi_reduction <add>, %50, %cst_37 [1] : vector<2x4x16x16xf32> to vector<2x16x16xf32>
    %52 = arith.addf %44, %51 : vector<2x16x16xf32>
    %c0_38 = arith.constant 0 : index
    %c0_39 = arith.constant 0 : index
    %c2_40 = arith.constant 2 : index
    %c0_41 = arith.constant 0 : index
    %53 = vector.load %arg3[%c0_38, %c0_39, %c2_40, %c0_41] : memref<1x4x18x18xf32, #tpu.memory_space<vmem>>, vector<1x4x16x18xf32>
    %54 = vector.shape_cast %53 : vector<1x4x16x18xf32> to vector<4x16x18xf32>
    %55 = vector.extract_strided_slice %54 {offsets = [0, 0, 0], sizes = [4, 16, 16], strides = [1, 1, 1]} : vector<4x16x18xf32> to vector<4x16x16xf32>
    %c6 = arith.constant 6 : index
    %c0_42 = arith.constant 0 : index
    %c0_43 = arith.constant 0 : index
    %c0_44 = arith.constant 0 : index
    %c0_45 = arith.constant 0 : index
    %56 = vector.load %arg4[%c6, %c0_42, %c0_43, %c0_44, %c0_45] : memref<9x2x4x16x16xf32, #tpu.memory_space<vmem>>, vector<1x2x4x16x16xf32>
    %57 = vector.shape_cast %56 : vector<1x2x4x16x16xf32> to vector<2x4x16x16xf32>
    %58 = vector.shape_cast %55 : vector<4x16x16xf32> to vector<1x4x16x16xf32>
    %59 = vector.broadcast %58 : vector<1x4x16x16xf32> to vector<2x4x16x16xf32>
    %60 = arith.mulf %57, %59 : vector<2x4x16x16xf32>
    %cst_46 = arith.constant dense<0.000000e+00> : vector<2x16x16xf32>
    %61 = vector.multi_reduction <add>, %60, %cst_46 [1] : vector<2x4x16x16xf32> to vector<2x16x16xf32>
    %62 = arith.addf %52, %61 : vector<2x16x16xf32>
    %63 = vector.extract_strided_slice %54 {offsets = [0, 0, 1], sizes = [4, 16, 16], strides = [1, 1, 1]} : vector<4x16x18xf32> to vector<4x16x16xf32>
    %c7 = arith.constant 7 : index
    %c0_47 = arith.constant 0 : index
    %c0_48 = arith.constant 0 : index
    %c0_49 = arith.constant 0 : index
    %c0_50 = arith.constant 0 : index
    %64 = vector.load %arg4[%c7, %c0_47, %c0_48, %c0_49, %c0_50] : memref<9x2x4x16x16xf32, #tpu.memory_space<vmem>>, vector<1x2x4x16x16xf32>
    %65 = vector.shape_cast %64 : vector<1x2x4x16x16xf32> to vector<2x4x16x16xf32>
    %66 = vector.shape_cast %63 : vector<4x16x16xf32> to vector<1x4x16x16xf32>
    %67 = vector.broadcast %66 : vector<1x4x16x16xf32> to vector<2x4x16x16xf32>
    %68 = arith.mulf %65, %67 : vector<2x4x16x16xf32>
    %cst_51 = arith.constant dense<0.000000e+00> : vector<2x16x16xf32>
    %69 = vector.multi_reduction <add>, %68, %cst_51 [1] : vector<2x4x16x16xf32> to vector<2x16x16xf32>
    %70 = arith.addf %62, %69 : vector<2x16x16xf32>
    %71 = vector.extract_strided_slice %54 {offsets = [0, 0, 2], sizes = [4, 16, 16], strides = [1, 1, 1]} : vector<4x16x18xf32> to vector<4x16x16xf32>
    %c8 = arith.constant 8 : index
    %c0_52 = arith.constant 0 : index
    %c0_53 = arith.constant 0 : index
    %c0_54 = arith.constant 0 : index
    %c0_55 = arith.constant 0 : index
    %72 = vector.load %arg4[%c8, %c0_52, %c0_53, %c0_54, %c0_55] : memref<9x2x4x16x16xf32, #tpu.memory_space<vmem>>, vector<1x2x4x16x16xf32>
    %73 = vector.shape_cast %72 : vector<1x2x4x16x16xf32> to vector<2x4x16x16xf32>
    %74 = vector.shape_cast %71 : vector<4x16x16xf32> to vector<1x4x16x16xf32>
    %75 = vector.broadcast %74 : vector<1x4x16x16xf32> to vector<2x4x16x16xf32>
    %76 = arith.mulf %73, %75 : vector<2x4x16x16xf32>
    %cst_56 = arith.constant dense<0.000000e+00> : vector<2x16x16xf32>
    %77 = vector.multi_reduction <add>, %76, %cst_56 [1] : vector<2x4x16x16xf32> to vector<2x16x16xf32>
    %78 = arith.addf %70, %77 : vector<2x16x16xf32>
    %c0_57 = arith.constant 0 : index
    %c0_58 = arith.constant 0 : index
    %c0_59 = arith.constant 0 : index
    %c0_60 = arith.constant 0 : index
    %79 = vector.load %arg5[%c0_57, %c0_58, %c0_59, %c0_60] : memref<1x2x16x16xf32, #tpu.memory_space<vmem>>, vector<1x2x16x16xf32>
    %80 = vector.shape_cast %79 : vector<1x2x16x16xf32> to vector<2x16x16xf32>
    %81 = vector.shape_cast %78 : vector<2x16x16xf32> to vector<1x2x16x16xf32>
    tpu.vector_store %arg5[%c0_57, %c0_58, %c0_59, %c0_60], %81 {strides = array<i32>} : memref<1x2x16x16xf32, #tpu.memory_space<vmem>>, vector<1x2x16x16xf32>,
    return
  }
  func.func @transform_0(%arg0: i32, %arg1: i32, %arg2: i32) -> (i32, i32, i32, i32) {
    %c0_i32 = arith.constant 0 : i32
    %c0_i32_0 = arith.constant 0 : i32
    %c0_i32_1 = arith.constant 0 : i32
    %c0_i32_2 = arith.constant 0 : i32
    return %arg2, %c0_i32, %c0_i32_0, %c0_i32_1 : i32, i32, i32, i32
  }
  func.func @transform_1(%arg0: i32, %arg1: i32, %arg2: i32) -> (i32, i32, i32, i32, i32) {
    %c0_i32 = arith.constant 0 : i32
    %c0_i32_0 = arith.constant 0 : i32
    %c0_i32_1 = arith.constant 0 : i32
    %c0_i32_2 = arith.constant 0 : i32
    return %c0_i32, %arg0, %c0_i32_0, %arg1, %c0_i32_1 : i32, i32, i32, i32, i32
  }
  func.func @transform_2(%arg0: i32, %arg1: i32, %arg2: i32) -> (i32, i32, i32, i32) {
    %c0_i32 = arith.constant 0 : i32
    %c0_i32_0 = arith.constant 0 : i32
    return %arg2, %arg0, %arg1, %c0_i32 : i32, i32, i32, i32
  }
}

</mosaic_0001>

<bundles_post_ra>
// kernel: locally_connected_2d.1
= control target key start
LH: loop header
LB: loop body
LE: loop exit
PB: predicated region body
PF: predicated region fallthrough
CT: control target
= control target key end

     0   :  { %7 = vsyncpa [#allocation3], 0  ;;  %s1909_s0 = inlined_call_operand.vmem [shape: f32[2,4,18,18], index: 0, kind: input, shape index: {}]   ;;  %s1910_s1 = inlined_call_operand.hbm [shape: f32[9,2,4,16,16], index: 1, kind: input, shape index: {}]   ;;  %s1911_s2 = inlined_call_operand.hbm [shape: f32[2,2,16,16], index: 2, kind: output, shape index: {}]  }
   0x1   :  { %8 = vsyncpa [#allocation4], 0 }
   0x2   :  { %10 = vsyncpa [#allocation4 + $0x1], 0  ;;  %s1311_s9 = smov 0   ;;  %s1313_s10 = smov 0  }
   0x3   :  { %s1315_s11 = smov 0   ;;  %s1317_s12 = smov 0  }
   0x4   :  { %s1319_s13 = smov 0   ;;  %s1321_s14 = smov 0  }
   0x5 LB: > { %s1092_s15 = sadd.s32 4294967295, %s1286_s14   ;;  %s1093_s16 = sadd.s32 4294967294, %s1286_s14   ;;  %s1286_s14 = sphi %s1321_s14, %s16_s14   ;;  %s1282_s13 = sphi %s1319_s13, %s1920_s13   ;;  %s1278_s12 = sphi %s1317_s12, %s1919_s12   ;;  %s1274_s11 = sphi %s1315_s11, %s1918_s11   ;;  %s1270_s10 = sphi %s1313_s10, %s1917_s10   ;;  %s1266_s9 = sphi %s1311_s9, %s1916_s9  }
   0x6   : > { %s28_s17 = sadd.s32 1, %s1282_s13  ;;  %s100_s18 = sadd.s32 1, %s1274_s11 }
   0x7   : > { %p29_p0 = scmp.ge.s32.totalorder %s28_s17, 2  ;;  %p110_p1 = scmp.ne.s32.totalorder %s1274_s11, %s1270_s10 }
   0x8   : > { %p111_p2 = scmp.eq.s32.totalorder %s1092_s15, 1  ;;  %p116_p3 = scmp.ne.s32.totalorder %s1270_s10, %s1266_s9 }
   0x9   : > { %s1922_s17 = smov (%p29_p0, %s28_s17), 0  ;;  %p117_p5 = scmp.eq.s32.totalorder %s1093_s16, 1 }
   0xa   : > { %p1351_p4 = por %p111_p2, %p110_p1  ;;  %s93_s20 = ssub.s32 %s1282_s13, %s1922_s17 }
   0xb   : > { %p1094_p6 = scmp.ge.s32.totalorder %s1286_s14, 1  ;;  %p98_p7 = scmp.eq.s32.totalorder %s93_s20, 0 }
   0xc   : > { %p1358_p8 = por %p117_p5, %p116_p3  ;;  %p124_p9 = scmp.lt.s32.totalorder %s1286_s14, 3 }
   0xd   : > { %s1364_s22 = scalar_select %p98_p7, %s1274_s11, %s100_s18  }
   0xe   : > { %p1366_p10 = pnand %p1094_p6, %p124_p9  ;;  %p1370_p11 = scmp.eq.s32.totalorder %s1092_s15, 0 }
   0xf   : > { %s1288_s25 = smov [#allocation2]  }
  0x10   : > { %p1114_p12 = pneg %p1366_p10  ;;  %s142_s26 = sshll.u32 %s1288_s25, 4  ;;  %s143_s26 = int_to_ptr.vmem [resolvable:$true] %s142_s26 }
  0x11   : > { %s1191_s27 = scalar_lea.vmem %s143_s26, 18432  ;;  %p1199_p5 = scmp.lt.s32.totalorder %s143_s26, %s143_s26 }
  0x12   : > { %p1115_p13 = pnand %p1370_p11, %p1114_p12  ;;  %p1192_p1 = scmp.ne.s32.totalorder %s143_s26, %s1191_s27 }
  0x13   : > { %p1200_p6 = scmp.lt.s32.totalorder %s1191_s27, %s1191_s27 }
  0x14   : > { %p1182_p0 = pneg %p1115_p13 }
  0x15   : > { %p1201_p7 = por %p1200_p6, %p1199_p5 }
  0x16   : > { %p1194_p2 = pnand %p1192_p1, %p1182_p0 }
  0x18   : > { %p1195_p3 = pneg %p1194_p2 }
  0x1a   : > { %p1202_p9 = pnand %p1201_p7, %p1195_p3 }
  0x1c   : > { %1205 = shalt.err (!%p1202_p9)
}
  0x1d   : > { %s1289_s28 = smov 128   ;;  %s1290_s29 = smov 8  }
  0x1e   : > { %1117 = dma.hbm_to_vmem [thread:$0]  (!%p1115_p13), %s1910_s1, 18432, %s143_s26, [#allocation3], %s1289_s28, %s1289_s28, %s1290_s29  }
  0x1f   : > { %166 = sbr.rel (%p1366_p10) target bundleno = 274 (0x112), region = 28 }
  0x24   : > { %1257 = dma.done.wait (%p1370_p11), [#allocation3], 18432  }
  0x25   : > { %1259 = vsyncadd (%p1370_p11), [#allocation3], 4294948864  ;;  %p188_p12 = scmp.lt.s32.totalorder %s1278_s12, 1  ;;  %v207_v1 = vld [vmem:[#allocation2 + $0x10] sm:$0xff]  ;;  %s1291_s15 = smov 127   ;;  %v205_v6 = vld [vmem:[#allocation2] sm:$0xff] }
  0x26   : > { %v215_v2 = vld [vmem:[#allocation2 + $0x50] sm:$0xff]  ;;  %v213_v7 = vld [vmem:[#allocation2 + $0x40] sm:$0xff]  ;;  %vm237_vm0 = vcmask 130048   ;;  %v208_v11 = vld [vmem:[#allocation2 + $0x18] sm:$0xff]  ;;  %s1292_s16 = smov 126   ;;  %s185_s18 = sand.u32 1, %s1270_s10  }
  0x27   : > { %s189_s4 = scalar_select %p188_p12, %s1278_s12, 1  ;;  %v216_v12 = vld [vmem:[#allocation2 + $0x58] sm:$0xff]  ;;  %v206_v18 = vld [vmem:[#allocation2 + $0x8] sm:$0xff]  ;;  %v209_v31 = vld [vmem:[#allocation2 + $0x20] sm:$0xff] }
  0x28   : > { %v214_v19 = vld [vmem:[#allocation2 + $0x48] sm:$0xff]  ;;  %v217_v32 = vld [vmem:[#allocation2 + $0x60] sm:$0xff]  ;;  %v211_v38 = vld [vmem:[#allocation2 + $0x30] sm:$0xff]  ;;  %s1835_s20 = sshll.u32 %s185_s18, 5  ;;  %s1106_s23 = sshll.u32 %s1278_s12, 9 }
  0x29   : > { %s1107_s5 = smul.u32 96, %s189_s4  ;;  %v210_v24 = vld [vmem:[#allocation2 + $0x28] sm:$0xff]  ;;  %v219_v39 = vld [vmem:[#allocation2 + $0x70] sm:$0xff]  ;;  %v212_v49 = vld [vmem:[#allocation2 + $0x38] sm:$0xff]  ;;  %s187_s24 = scalar_lea.vmem [#allocation5], %s1835_s20 }
  0x2a   : > { %v218_v25 = vld [vmem:[#allocation2 + $0x68] sm:$0xff]  ;;  %v220_v56 = vld [vmem:[#allocation2 + $0x78] sm:$0xff]  ;;  %v465_v57 = vld [vmem:[#allocation2 + $0x180] sm:$0xff]  ;;  %s997_s25 = sshll.u32 %s187_s24, 4  ;;  %s1854_s27 = scalar_lea.hbm %s1911_s2, %s1106_s23  ;;  %s1856_s25 = int_to_ptr.vmem [resolvable:$true] %s997_s25 }
  0x2b   : > { %s1392_s8 = scalar_lea.vmem %s1909_s0, %s1107_s5  ;;  %v466_v50 = vld [vmem:[#allocation2 + $0x188] sm:$0xff]  ;;  %v473_v58 = vld [vmem:[#allocation2 + $0x1c0] sm:$0xff]  ;;  %v468_v62 = vld [vmem:[#allocation2 + $0x198] sm:$0xff]  ;;  %s1864_s28 = scalar_lea.sflag [#allocation4], %s185_s18 }
  0x2c   : > { %v1395_v0 = vld [vmem:[%s1392_s8 + $0x18] sm:$0xff]  ;;  %v1402_v5 = vld [vmem:[%s1392_s8] sm:$0xff]  ;;  %v1416_v17 = vld [vmem:[%s1392_s8 + $0x8] sm:$0xff]  ;;  %s1206_s29 = scalar_lea.vmem %s1856_s25, 512  ;;  %s1293_s30 = smov [#allocation5]  }
  0x2d   : > { %299 = vrot.lane.b32.xlu1 %v1395_v0, %s1291_s15  ;;  %v223_v3 = vmul.f32 %v207_v1, %v1395_v0  ;;  %v231_v4 = vmul.f32 %v215_v2, %v1395_v0  ;;  %295 = vrot.lane.b32.xlu0 %v1402_v5, %s1291_s15  ;;  %v221_v8 = vmul.f32 %v205_v6, %v1402_v5  ;;  %v1409_v10 = vld [vmem:[%s1392_s8 + $0x20] sm:$0xff]  ;;  %v1427_v30 = vld [vmem:[%s1392_s8 + $0x38] sm:$0xff]  ;;  %v474_v51 = vld [vmem:[#allocation2 + $0x1c8] sm:$0xff]  ;;  %p1207_p10 = scmp.ne.s32.totalorder %s1856_s25, %s1206_s29  ;;  %s1210_s3 = sshll.u32 %s1293_s30, 4  ;;  %s1211_s3 = int_to_ptr.vmem [resolvable:$false] %s1210_s3 }
  0x2e   : > { %v229_v9 = vmul.f32 %v213_v7, %v1402_v5  ;;  %v224_v15 = vmul.f32 %v208_v11, %v1409_v10  ;;  %v232_v16 = vmul.f32 %v216_v12, %v1409_v10  ;;  %v222_v22 = vmul.f32 %v206_v18, %v1416_v17  ;;  %v1436_v37 = vld [vmem:[%s1392_s8 + $0x30] sm:$0xff]  ;;  %v1441_v44 = vld [vmem:[%s1392_s8 + $0x48] sm:$0xff]  ;;  %v476_v63 = vld [vmem:[#allocation2 + $0x1d8] sm:$0xff]  ;;  %s1212_s4 = scalar_lea.vmem %s1211_s3, 1024  ;;  %p1213_p0 = scmp.lt.s32.totalorder %s1856_s25, %s1211_s3 }
  0x2f   : > { %v239_v13 = vsel %vm237_vm0, %v223_v3, 0.0  ;;  %v253_v14 = vsel %vm237_vm0, %v231_v4, 0.0  ;;  %v238_v20 = vsel %vm237_vm0, %v221_v8, 0.0  ;;  %v230_v23 = vmul.f32 %v214_v19, %v1416_v17  ;;  %v1462_v61 = vld [vmem:[%s1392_s8 + $0x9] sm:$0xff]  ;;  %v1476_v7 = vld [vmem:[%s1392_s8 + $0x1] sm:$0xff]  ;;  %p1208_p11 = pnand %p1207_p10, %p1351_p4  ;;  %p1214_p1 = scmp.lt.s32.totalorder %s1212_s4, %s1206_s29 }
  0x30   : > { %v252_v21 = vsel %vm237_vm0, %v229_v9, 0.0  ;;  %v240_v26 = vadd.f32 %v239_v13, %v238_v20  ;;  %v246_v28 = vsel %vm237_vm0, %v224_v15, 0.0  ;;  %v260_v29 = vsel %vm237_vm0, %v232_v16, 0.0  ;;  %v1471_v3 = vld [vmem:[%s1392_s8 + $0x50] sm:$0xff]  ;;  %v1479_v8 = vld [vmem:[%s1392_s8 + $0x21] sm:$0xff] }
  0x31   : > { %v254_v27 = vadd.f32 %v253_v14, %v252_v21  ;;  %301 = vrot.lane.b32.xlu1 %v1409_v10, %s1291_s15  ;;  %v245_v33 = vsel %vm237_vm0, %v222_v22, 0.0  ;;  %v259_v34 = vsel %vm237_vm0, %v230_v23, 0.0  ;;  %297 = vrot.lane.b32.xlu0 %v1416_v17, %s1291_s15  ;;  %v226_v35 = vmul.f32 %v210_v24, %v1427_v30  ;;  %v1486_v14 = vld [vmem:[%s1392_s8 + $0x19] sm:$0xff]  ;;  %v467_v15 = vld [vmem:[#allocation2 + $0x190] sm:$0xff]  ;;  %v470_v22 = vld [vmem:[#allocation2 + $0x1a8] sm:$0xff]  ;;  %p1209_p13 = pneg %p1208_p11  ;;  %p1215_p2 = por %p1214_p1, %p1213_p0 }
  0x32   : > { %v234_v36 = vmul.f32 %v218_v25, %v1427_v30  ;;  %v247_v40 = vadd.f32 %v246_v28, %v245_v33  ;;  %v261_v41 = vadd.f32 %v260_v29, %v259_v34  ;;  %v225_v42 = vmul.f32 %v209_v31, %v1436_v37  ;;  %v475_v16 = vld [vmem:[#allocation2 + $0x1d0] sm:$0xff]  ;;  %v478_v23 = vld [vmem:[#allocation2 + $0x1e8] sm:$0xff]  ;;  %v469_v24 = vld [vmem:[#allocation2 + $0x1a0] sm:$0xff] }
  0x33   : > { %v233_v43 = vmul.f32 %v217_v32, %v1436_v37  ;;  %v248_v45 = vsel %vm237_vm0, %v226_v35, 0.0  ;;  %v227_v47 = vmul.f32 %v211_v38, %v1441_v44  ;;  %v235_v48 = vmul.f32 %v219_v39, %v1441_v44  ;;  %v1505_v28 = vld [vmem:[%s1392_s8 + $0x39] sm:$0xff]  ;;  %v1510_v35 = vld [vmem:[%s1392_s8 + $0x31] sm:$0xff]  ;;  %p1216_p3 = pnand %p1215_p2, %p1209_p13 }
  0x34   : > { %v262_v46 = vsel %vm237_vm0, %v234_v36, 0.0  ;;  %v1449_v52 = vadd.f32 %v248_v45, %v247_v40  ;;  %v241_v54 = vsel %vm237_vm0, %v225_v42, 0.0  ;;  %v482_v4 = vmul.f32 %v466_v50, %v1462_v61  ;;  %v477_v29 = vld [vmem:[#allocation2 + $0x1e0] sm:$0xff]  ;;  %v472_v36 = vld [vmem:[#allocation2 + $0x1b8] sm:$0xff] }
  0x35   : > { %305 = vrot.lane.b32.xlu1 %v1427_v30, %s1291_s15  ;;  %v1451_v53 = vadd.f32 %v262_v46, %v261_v41  ;;  %v255_v55 = vsel %vm237_vm0, %v233_v43, 0.0  ;;  %303 = vrot.lane.b32.xlu0 %v1436_v37, %s1291_s15  ;;  %v1457_v59 = vadd.f32 %v241_v54, %v240_v26  ;;  %v1465_v1 = vsel %vm237_vm0, %v227_v47, 0.0  ;;  %v480_v38 = vld [vmem:[#allocation2 + $0x1f8] sm:$0xff] }
  0x36   : > { %v1459_v60 = vadd.f32 %v255_v55, %v254_v27  ;;  %v1468_v2 = vsel %vm237_vm0, %v235_v48, 0.0  ;;  %v490_v6 = vmul.f32 %v474_v51, %v1462_v61  ;;  %v481_v9 = vmul.f32 %v465_v57, %v1476_v7  ;;  %v1517_v43 = vld [vmem:[%s1392_s8 + $0x51] sm:$0xff] }
  0x37   : > { %v489_v11 = vmul.f32 %v473_v58, %v1476_v7  ;;  %v484_v12 = vmul.f32 %v468_v62, %v1479_v8  ;;  %v492_v13 = vmul.f32 %v476_v63, %v1479_v8  ;;  %v1491_v18 = vmul.f32 %v212_v49, %v1471_v3  ;;  %v471_v55 = vld [vmem:[#allocation2 + $0x1b0] sm:$0xff] }
  0x38   : > { %v1494_v19 = vmul.f32 %v220_v56, %v1471_v3  ;;  %v504_v20 = vsel %vm237_vm0, %v482_v4, 0.0  ;;  %v518_v21 = vsel %vm237_vm0, %v490_v6, 0.0  ;;  %v497_v25 = vsel %vm237_vm0, %v481_v9, 0.0  ;;  %v725_v56 = vld [vmem:[#allocation2 + $0x308] sm:$0xff]  ;;  %v732_v6 = vld [vmem:[#allocation2 + $0x340] sm:$0xff] }
  0x39   : > { %384 = vrot.lane.b32.xlu1 %v1402_v5, %s1292_s16  ;;  %307 = vrot.lane.b32.xlu0 %v1441_v44, %s1291_s15  ;;  %v511_v5 = vsel %vm237_vm0, %v489_v11, 0.0  ;;  %v505_v26 = vsel %vm237_vm0, %v484_v12, 0.0  ;;  %v519_v27 = vsel %vm237_vm0, %v492_v13, 0.0  ;;  %v483_v33 = vmul.f32 %v467_v15, %v1486_v14  ;;  %v733_v4 = vld [vmem:[#allocation2 + $0x348] sm:$0xff] }
  0x3a   : > { %v506_v31 = vadd.f32 %v505_v26, %v504_v20  ;;  %v520_v32 = vadd.f32 %v519_v27, %v518_v21  ;;  %v491_v34 = vmul.f32 %v475_v16, %v1486_v14  ;;  %v486_v39 = vmul.f32 %v470_v22, %v1505_v28  ;;  %v1534_v15 = vld [vmem:[%s1392_s8 + $0x49] sm:$0xff]  ;;  %v727_v16 = vld [vmem:[#allocation2 + $0x318] sm:$0xff] }
  0x3b   : > { %v494_v40 = vmul.f32 %v478_v23, %v1505_v28  ;;  %v485_v41 = vmul.f32 %v469_v24, %v1510_v35  ;;  %v493_v42 = vmul.f32 %v477_v29, %v1510_v35  ;;  %v498_v45 = vsel %vm237_vm0, %v483_v33, 0.0  ;;  %v735_v20 = vld [vmem:[#allocation2 + $0x358] sm:$0xff] }
  0x3c   : > { %v512_v46 = vsel %vm237_vm0, %v491_v34, 0.0  ;;  %v488_v47 = vmul.f32 %v472_v36, %v1517_v43  ;;  %v496_v48 = vmul.f32 %v480_v38, %v1517_v43  ;;  %v499_v49 = vadd.f32 %v498_v45, %v497_v25  ;;  %v1545_v25 = vld [vmem:[%s1392_s8 + $0xa] sm:$0xff] }
  0x3d   : > { %388 = vrot.lane.b32.xlu1 %v1395_v0, %s1292_s16  ;;  %386 = vrot.lane.b32.xlu0 %v1416_v17, %s1292_s16  ;;  %v513_v50 = vadd.f32 %v512_v46, %v511_v5  ;;  %v507_v51 = vsel %vm237_vm0, %v486_v39, 0.0  ;;  %v521_v54 = vsel %vm237_vm0, %v494_v40, 0.0  ;;  %v479_v0 = vld [vmem:[#allocation2 + $0x1f0] sm:$0xff]  ;;  %v500_v62 = vsel %vm237_vm0, %v485_v41, 0.0  ;;  %v724_v17 = vld [vmem:[#allocation2 + $0x300] sm:$0xff]  ;;  %v729_v40 = vld [vmem:[#allocation2 + $0x328] sm:$0xff] }
  0x3e   : > { %v508_v57 = vadd.f32 %v507_v51, %v506_v31  ;;  %v522_v58 = vadd.f32 %v521_v54, %v520_v32  ;;  %v514_v63 = vsel %vm237_vm0, %v493_v42, 0.0  ;;  %v501_v9 = vadd.f32 %v500_v62, %v499_v49  ;;  %v1548_v5 = vld [vmem:[%s1392_s8 + $0x2] sm:$0xff]  ;;  %v734_v39 = vld [vmem:[#allocation2 + $0x350] sm:$0xff] }
  0x3f   : > { %v515_v11 = vadd.f32 %v514_v63, %v513_v50  ;;  %v509_v12 = vsel %vm237_vm0, %v488_v47, 0.0  ;;  %v523_v13 = vsel %vm237_vm0, %v496_v48, 0.0  ;;  %v487_v23 = vmul.f32 %v471_v55, %v1534_v15  ;;  %v1557_v32 = vld [vmem:[%s1392_s8 + $0x22] sm:$0xff]  ;;  %v1586_v63 = vld [vmem:[%s1392_s8 + $0x32] sm:$0xff] }
  0x40   : > { %v1538_v21 = vadd.f32 %v509_v12, %v508_v57  ;;  %v1540_v22 = vadd.f32 %v523_v13, %v522_v58  ;;  %v495_v24 = vmul.f32 %v479_v0, %v1534_v15  ;;  %v741_v26 = vmul.f32 %v725_v56, %v1545_v25  ;;  %v737_v47 = vld [vmem:[#allocation2 + $0x368] sm:$0xff]  ;;  %v728_v48 = vld [vmem:[#allocation2 + $0x320] sm:$0xff] }
  0x41   : > { %309 = vrot.lane.b32.xlu1 %v1471_v3, %s1291_s15  ;;  %390 = vrot.lane.b32.xlu0 %v1409_v10, %s1292_s16  ;;  %v749_v27 = vmul.f32 %v733_v4, %v1545_v25  ;;  %v740_v29 = vmul.f32 %v724_v17, %v1548_v5  ;;  %v748_v31 = vmul.f32 %v732_v6, %v1548_v5  ;;  %v502_v33 = vsel %vm237_vm0, %v487_v23, 0.0  ;;  %v726_v10 = vld [vmem:[#allocation2 + $0x310] sm:$0xff]  ;;  %v736_v49 = vld [vmem:[#allocation2 + $0x360] sm:$0xff] }
  0x42   : > { %v516_v34 = vsel %vm237_vm0, %v495_v24, 0.0  ;;  %v743_v36 = vmul.f32 %v727_v16, %v1557_v32  ;;  %v751_v38 = vmul.f32 %v735_v20, %v1557_v32  ;;  %v1563_v41 = vadd.f32 %v502_v33, %v501_v9  ;;  %v1576_v0 = vld [vmem:[%s1392_s8 + $0x1a] sm:$0xff] }
  0x43   : > { %v1565_v42 = vadd.f32 %v516_v34, %v515_v11  ;;  %v763_v45 = vsel %vm237_vm0, %v741_v26, 0.0  ;;  %v777_v46 = vsel %vm237_vm0, %v749_v27, 0.0  ;;  %v756_v50 = vsel %vm237_vm0, %v740_v29, 0.0  ;;  %v730_v26 = vld [vmem:[#allocation2 + $0x330] sm:$0xff] }
  0x44   : > { %v770_v51 = vsel %vm237_vm0, %v748_v31, 0.0  ;;  %v764_v54 = vsel %vm237_vm0, %v743_v36, 0.0  ;;  %v778_v55 = vsel %vm237_vm0, %v751_v38, 0.0  ;;  %v742_v58 = vmul.f32 %v726_v10, %v1576_v0  ;;  %v738_v27 = vld [vmem:[#allocation2 + $0x370] sm:$0xff] }
  0x45   : > { %394 = vrot.lane.b32.xlu1 %v1427_v30, %s1292_s16  ;;  %392 = vrot.lane.b32.xlu0 %v1436_v37, %s1292_s16  ;;  %v765_v56 = vadd.f32 %v764_v54, %v763_v45  ;;  %v779_v57 = vadd.f32 %v778_v55, %v777_v46  ;;  %v750_v62 = vmul.f32 %v734_v39, %v1576_v0  ;;  %v1583_v30 = vld [vmem:[%s1392_s8 + $0x3a] sm:$0xff]  ;;  %v250_v37 = vsel %vm237_vm0, %v1491_v18, 0.0  ;;  %v721_v34 = vld [vmem:[%s1392_s8 + $0x4a] sm:$0xff] }
  0x46   : > { %v745_v4 = vmul.f32 %v729_v40, %v1583_v30  ;;  %v753_v17 = vmul.f32 %v737_v47, %v1583_v30  ;;  %v744_v6 = vmul.f32 %v728_v48, %v1586_v63  ;;  %v752_v9 = vmul.f32 %v736_v49, %v1586_v63  ;;  %v280_v48 = vld [vmem:[#allocation2 + $0xc8] sm:$0xff] }
  0x47   : > { %v264_v11 = vsel %vm237_vm0, %v1494_v19, 0.0  ;;  %v757_v12 = vsel %vm237_vm0, %v742_v58, 0.0  ;;  %v771_v13 = vsel %vm237_vm0, %v750_v62, 0.0  ;;  %v746_v36 = vmul.f32 %v730_v26, %v721_v34 }
  0x48   : > { %v758_v16 = vadd.f32 %v757_v12, %v756_v50  ;;  %v772_v20 = vadd.f32 %v771_v13, %v770_v51  ;;  %v766_v23 = vsel %vm237_vm0, %v745_v4, 0.0  ;;  %v780_v24 = vsel %vm237_vm0, %v753_v17, 0.0 }
  0x49   : > { %398 = vrot.lane.b32.xlu1 %v1471_v3, %s1292_s16  ;;  %396 = vrot.lane.b32.xlu0 %v1441_v44, %s1292_s16  ;;  %v1604_v18 = vadd.f32 %v766_v23, %v765_v56  ;;  %v1606_v19 = vadd.f32 %v780_v24, %v779_v57  ;;  %v759_v29 = vsel %vm237_vm0, %v744_v6, 0.0  ;;  %v773_v31 = vsel %vm237_vm0, %v752_v9, 0.0  ;;  %v275_v6 = vld [vmem:[#allocation2 + $0xa0] sm:$0xff] }
  0x4a   : > { %v760_v3 = vadd.f32 %v759_v29, %v758_v16  ;;  %v774_v33 = vadd.f32 %v773_v31, %v772_v20  ;;  %v754_v38 = vmul.f32 %v738_v27, %v721_v34  ;;  %v1615_v10 = vadd.f32 %v1465_v1, %v1457_v59  ;;  %v279_v1 = vld [vmem:[#allocation2 + $0xc0] sm:$0xff] }
  0x4b   : > { %v1619_v44 = vadd.f32 %v1468_v2, %v1459_v60  ;;  %v1622_v39 = vadd.f32 %v250_v37, %v1449_v52  ;;  %v1625_v40 = vadd.f32 %v264_v11, %v1451_v53  ;;  %v761_v45 = vsel %vm237_vm0, %v746_v36, 0.0  ;;  %v1684_v52 = vld [vmem:[%s1392_s8 + $0x52] sm:$0xff]  ;;  %v283_v9 = vld [vmem:[#allocation2 + $0xe0] sm:$0xff] }
  0x4c   : > { %v775_v46 = vsel %vm237_vm0, %v754_v38, 0.0  ;;  %v1631_v47 = vadd.f32 %v761_v45, %v760_v3  ;;  %v273_v53 = vld [vmem:[#allocation2 + $0x90] sm:$0xff] }
  0x4d   : > { %556 = vrot.lane.b32.xlu1 %v1462_v61, %s1291_s15  ;;  %554 = vrot.lane.b32.xlu0 %v1476_v7, %s1291_s15  ;;  %v1633_v59 = vadd.f32 %v775_v46, %v774_v33  ;;  %v281_v60 = vld [vmem:[#allocation2 + $0xd0] sm:$0xff] }
  0x4e   : > { %v277_v3 = vld [vmem:[#allocation2 + $0xb0] sm:$0xff] }
  0x4f   : > { %v285_v33 = vld [vmem:[#allocation2 + $0xf0] sm:$0xff] }
  0x51   : > { %560 = vrot.lane.b32.xlu1 %v1479_v8, %s1291_s15  ;;  %558 = vrot.lane.b32.xlu0 %v1486_v14, %s1291_s15 }
  0x55   : > { %564 = vrot.lane.b32.xlu1 %v1505_v28, %s1291_s15  ;;  %562 = vrot.lane.b32.xlu0 %v1510_v35, %s1291_s15 }
  0x59   : > { %645 = vrot.lane.b32.xlu1 %v1462_v61, %s1292_s16  ;;  %643 = vrot.lane.b32.xlu0 %v1476_v7, %s1292_s16  ;;  %v271_v61 = vld [vmem:[#allocation2 + $0x80] sm:$0xff] }
  0x5d   : > { %649 = vrot.lane.b32.xlu1 %v1479_v8, %s1292_s16  ;;  %647 = vrot.lane.b32.xlu0 %v1486_v14, %s1292_s16 }
  0x61   : > { %568 = vrot.lane.b32.xlu1 %v1517_v43, %s1291_s15  ;;  %566 = vrot.lane.b32.xlu0 %v1534_v15, %s1291_s15 }
  0x65   : > { %653 = vrot.lane.b32.xlu1 %v1505_v28, %s1292_s16  ;;  %651 = vrot.lane.b32.xlu0 %v1510_v35, %s1292_s16 }
  0x69   : > { %657 = vrot.lane.b32.xlu1 %v1517_v43, %s1292_s16  ;;  %655 = vrot.lane.b32.xlu0 %v1534_v15, %s1292_s16  ;;  %v274_v43 = vld [vmem:[#allocation2 + $0x98] sm:$0xff] }
  0x6a   : > { %v282_v15 = vld [vmem:[#allocation2 + $0xd8] sm:$0xff] }
  0x6d   : > { %815 = vrot.lane.b32.xlu1 %v1545_v25, %s1291_s15  ;;  %813 = vrot.lane.b32.xlu0 %v1548_v5, %s1291_s15 }
  0x71   : > { %819 = vrot.lane.b32.xlu1 %v1557_v32, %s1291_s15  ;;  %817 = vrot.lane.b32.xlu0 %v1576_v0, %s1291_s15 }
  0x75   : > { %823 = vrot.lane.b32.xlu1 %v1583_v30, %s1291_s15  ;;  %821 = vrot.lane.b32.xlu0 %v1586_v63, %s1291_s15 }
  0x79   : > { %904 = vrot.lane.b32.xlu1 %v1545_v25, %s1292_s16  ;;  %902 = vrot.lane.b32.xlu0 %v1548_v5, %s1292_s16 }
  0x7d   : > { %908 = vrot.lane.b32.xlu1 %v1557_v32, %s1292_s16  ;;  %906 = vrot.lane.b32.xlu0 %v1576_v0, %s1292_s16  ;;  %v272_v32 = vld [vmem:[#allocation2 + $0x88] sm:$0xff] }
  0x81   : > { %827 = vrot.lane.b32.xlu1 %v1684_v52, %s1291_s15  ;;  %825 = vrot.lane.b32.xlu0 %v721_v34, %s1291_s15 }
  0x85   : > { %912 = vrot.lane.b32.xlu1 %v1583_v30, %s1292_s16  ;;  %910 = vrot.lane.b32.xlu0 %v1586_v63, %s1292_s16  ;;  %v276_v30 = vld [vmem:[#allocation2 + $0xa8] sm:$0xff] }
  0x86   : > { %v284_v63 = vld [vmem:[#allocation2 + $0xe8] sm:$0xff] }
  0x89   : > { %916 = vrot.lane.b32.xlu1 %v1684_v52, %s1292_s16  ;;  %914 = vrot.lane.b32.xlu0 %v721_v34, %s1292_s16 }
  0x9f   : > { %v300_v2 = vpop.permute.xlu1 %299  ;;  %v296_v14 = vpop.permute.xlu0 %295 }
  0xa0   : > { %v321_v7 = vmul.f32 %v300_v2, %v273_v53  ;;  %v329_v8 = vmul.f32 %v300_v2, %v281_v60  ;;  %v319_v28 = vmul.f32 %v296_v14, %v271_v61  ;;  %v327_v35 = vmul.f32 %v296_v14, %v279_v1 }
  0xa2   : > { %v336_v25 = vsel %vm237_vm0, %v321_v7, 0.0  ;;  %v350_v5 = vsel %vm237_vm0, %v329_v8, 0.0  ;;  %v335_v49 = vsel %vm237_vm0, %v319_v28, 0.0  ;;  %v349_v50 = vsel %vm237_vm0, %v327_v35, 0.0  ;;  %v368_v7 = vld [vmem:[#allocation2 + $0x100] sm:$0xff] }
  0xa3   : > { %v302_v51 = vpop.permute.xlu1 %301  ;;  %v337_v54 = vadd.f32 %v336_v25, %v335_v49  ;;  %v351_v55 = vadd.f32 %v350_v5, %v349_v50  ;;  %v298_v57 = vpop.permute.xlu0 %297  ;;  %v376_v8 = vld [vmem:[#allocation2 + $0x140] sm:$0xff]  ;;  %v370_v25 = vld [vmem:[#allocation2 + $0x110] sm:$0xff]  ;;  %v278_v50 = vld [vmem:[#allocation2 + $0xb8] sm:$0xff] }
  0xa4   : > { %v322_v0 = vmul.f32 %v302_v51, %v274_v43  ;;  %v330_v56 = vmul.f32 %v302_v51, %v282_v15  ;;  %v320_v58 = vmul.f32 %v298_v57, %v272_v32  ;;  %v328_v62 = vmul.f32 %v298_v57, %v280_v48  ;;  %v378_v5 = vld [vmem:[#allocation2 + $0x150] sm:$0xff]  ;;  %v286_v51 = vld [vmem:[#allocation2 + $0xf8] sm:$0xff] }
  0xa6   : > { %v343_v4 = vsel %vm237_vm0, %v322_v0, 0.0  ;;  %v357_v17 = vsel %vm237_vm0, %v330_v56, 0.0  ;;  %v342_v37 = vsel %vm237_vm0, %v320_v58, 0.0  ;;  %v356_v11 = vsel %vm237_vm0, %v328_v62, 0.0  ;;  %v371_v0 = vld [vmem:[#allocation2 + $0x118] sm:$0xff]  ;;  %v369_v62 = vld [vmem:[#allocation2 + $0x108] sm:$0xff] }
  0xa7   : > { %v306_v12 = vpop.permute.xlu1 %305  ;;  %v344_v13 = vadd.f32 %v343_v4, %v342_v37  ;;  %v358_v16 = vadd.f32 %v357_v17, %v356_v11  ;;  %v304_v24 = vpop.permute.xlu0 %303  ;;  %v379_v56 = vld [vmem:[#allocation2 + $0x158] sm:$0xff] }
  0xa8   : > { %v324_v20 = vmul.f32 %v306_v12, %v276_v30  ;;  %v332_v23 = vmul.f32 %v306_v12, %v284_v63  ;;  %v323_v26 = vmul.f32 %v304_v24, %v275_v6  ;;  %v331_v27 = vmul.f32 %v304_v24, %v283_v9  ;;  %v377_v30 = vld [vmem:[#allocation2 + $0x148] sm:$0xff]  ;;  %v372_v24 = vld [vmem:[#allocation2 + $0x120] sm:$0xff] }
  0xa9   : > { %v373_v12 = vld [vmem:[#allocation2 + $0x128] sm:$0xff] }
  0xaa   : > { %v345_v29 = vsel %vm237_vm0, %v324_v20, 0.0  ;;  %v359_v31 = vsel %vm237_vm0, %v332_v23, 0.0  ;;  %v338_v38 = vsel %vm237_vm0, %v323_v26, 0.0  ;;  %v352_v45 = vsel %vm237_vm0, %v331_v27, 0.0  ;;  %v380_v26 = vld [vmem:[#allocation2 + $0x160] sm:$0xff] }
  0xab   : > { %v346_v34 = vadd.f32 %v345_v29, %v344_v13  ;;  %v360_v36 = vadd.f32 %v359_v31, %v358_v16  ;;  %v385_v46 = vpop.permute.xlu1 %384  ;;  %v339_v53 = vadd.f32 %v338_v38, %v337_v54  ;;  %v353_v60 = vadd.f32 %v352_v45, %v351_v55  ;;  %v308_v61 = vpop.permute.xlu0 %307  ;;  %v381_v13 = vld [vmem:[#allocation2 + $0x168] sm:$0xff] }
  0xac   : > { %v325_v1 = vmul.f32 %v308_v61, %v277_v3  ;;  %v333_v2 = vmul.f32 %v308_v61, %v285_v33  ;;  %v408_v48 = vmul.f32 %v385_v46, %v368_v7  ;;  %v416_v49 = vmul.f32 %v385_v46, %v376_v8  ;;  %v375_v8 = vld [vmem:[#allocation2 + $0x138] sm:$0xff] }
  0xae   : > { %v340_v14 = vsel %vm237_vm0, %v325_v1, 0.0  ;;  %v354_v28 = vsel %vm237_vm0, %v333_v2, 0.0  ;;  %v424_v9 = vsel %vm237_vm0, %v408_v48, 0.0  ;;  %v438_v37 = vsel %vm237_vm0, %v416_v49, 0.0 }
  0xaf   : > { %v389_v35 = vpop.permute.xlu1 %388  ;;  %v341_v43 = vadd.f32 %v340_v14, %v339_v53  ;;  %v355_v15 = vadd.f32 %v354_v28, %v353_v60  ;;  %v387_v32 = vpop.permute.xlu0 %386  ;;  %v383_v14 = vld [vmem:[#allocation2 + $0x178] sm:$0xff] }
  0xb0   : > { %v410_v57 = vmul.f32 %v389_v35, %v370_v25  ;;  %v418_v58 = vmul.f32 %v389_v35, %v378_v5  ;;  %v417_v16 = vmul.f32 %v387_v32, %v377_v30 }
  0xb1   : > { %v1711_v54 = vadd.f32 %v341_v43, %v1615_v10  ;;  %v1714_v55 = vadd.f32 %v355_v15, %v1619_v44  ;;  %v409_v44 = vmul.f32 %v387_v32, %v369_v62  ;;  %v374_v43 = vld [vmem:[#allocation2 + $0x130] sm:$0xff] }
  0xb2   : > { %v425_v27 = vsel %vm237_vm0, %v410_v57, 0.0  ;;  %v439_v29 = vsel %vm237_vm0, %v418_v58, 0.0  ;;  %v382_v15 = vld [vmem:[#allocation2 + $0x170] sm:$0xff] }
  0xb3   : > { %v310_v63 = vpop.permute.xlu1 %309  ;;  %v391_v6 = vpop.permute.xlu0 %390  ;;  %v431_v28 = vsel %vm237_vm0, %v409_v44, 0.0  ;;  %v426_v48 = vadd.f32 %v425_v27, %v424_v9  ;;  %v440_v49 = vadd.f32 %v439_v29, %v438_v37 }
  0xb4   : > { %v326_v4 = vmul.f32 %v310_v63, %v278_v50  ;;  %v334_v17 = vmul.f32 %v310_v63, %v286_v51  ;;  %v411_v11 = vmul.f32 %v391_v6, %v371_v0  ;;  %v419_v10 = vmul.f32 %v391_v6, %v379_v56 }
  0xb6   : > { %v347_v20 = vsel %vm237_vm0, %v326_v4, 0.0  ;;  %v361_v23 = vsel %vm237_vm0, %v334_v17, 0.0  ;;  %v432_v38 = vsel %vm237_vm0, %v411_v11, 0.0  ;;  %v446_v45 = vsel %vm237_vm0, %v419_v10, 0.0 }
  0xb7   : > { %v348_v31 = vadd.f32 %v347_v20, %v346_v34  ;;  %v362_v3 = vadd.f32 %v361_v23, %v360_v36  ;;  %v395_v33 = vpop.permute.xlu1 %394  ;;  %v393_v60 = vpop.permute.xlu0 %392  ;;  %v445_v34 = vsel %vm237_vm0, %v417_v16, 0.0  ;;  %v433_v25 = vadd.f32 %v432_v38, %v431_v28  ;;  %v731_v23 = vld [vmem:[#allocation2 + $0x338] sm:$0xff]  ;;  %v543_v28 = vld [vmem:[#allocation2 + $0x268] sm:$0xff] }
  0xb8   : > { %v413_v46 = vmul.f32 %v395_v33, %v373_v12  ;;  %v421_v53 = vmul.f32 %v395_v33, %v381_v13  ;;  %v412_v2 = vmul.f32 %v393_v60, %v372_v24  ;;  %v420_v7 = vmul.f32 %v393_v60, %v380_v26  ;;  %v739_v24 = vld [vmem:[#allocation2 + $0x378] sm:$0xff]  ;;  %v531_v60 = vld [vmem:[#allocation2 + $0x208] sm:$0xff] }
  0xb9   : > { %v364_v61 = vadd.f32 %v348_v31, %v1622_v39  ;;  %v366_v1 = vadd.f32 %v362_v3, %v1625_v40  ;;  %v447_v5 = vadd.f32 %v446_v45, %v445_v34 }
  0xba   : > { %v434_v36 = vsel %vm237_vm0, %v413_v46, 0.0  ;;  %v448_v35 = vsel %vm237_vm0, %v421_v53, 0.0  ;;  %v427_v39 = vsel %vm237_vm0, %v412_v2, 0.0  ;;  %v441_v40 = vsel %vm237_vm0, %v420_v7, 0.0  ;;  %v533_v53 = vld [vmem:[#allocation2 + $0x218] sm:$0xff]  ;;  %v532_v2 = vld [vmem:[#allocation2 + $0x210] sm:$0xff] }
  0xbb   : > { %v399_v32 = vpop.permute.xlu1 %398  ;;  %v397_v0 = vpop.permute.xlu0 %396  ;;  %v435_v56 = vadd.f32 %v434_v36, %v433_v25  ;;  %v449_v57 = vadd.f32 %v448_v35, %v447_v5  ;;  %v428_v30 = vadd.f32 %v427_v39, %v426_v48  ;;  %v442_v63 = vadd.f32 %v441_v40, %v440_v49 }
  0xbc   : > { %v415_v50 = vmul.f32 %v399_v32, %v375_v8  ;;  %v423_v51 = vmul.f32 %v399_v32, %v383_v14  ;;  %v414_v58 = vmul.f32 %v397_v0, %v374_v43  ;;  %v422_v62 = vmul.f32 %v397_v0, %v382_v15  ;;  %v534_v43 = vld [vmem:[#allocation2 + $0x220] sm:$0xff] }
  0xbd   : > { %v747_v46 = vmul.f32 %v731_v23, %v1684_v52  ;;  %v542_v15 = vld [vmem:[#allocation2 + $0x260] sm:$0xff] }
  0xbe   : > { %v436_v4 = vsel %vm237_vm0, %v415_v50, 0.0  ;;  %v450_v17 = vsel %vm237_vm0, %v423_v51, 0.0  ;;  %v429_v10 = vsel %vm237_vm0, %v414_v58, 0.0  ;;  %v443_v9 = vsel %vm237_vm0, %v422_v62, 0.0 }
  0xbf   : > { %v437_v6 = vadd.f32 %v436_v4, %v435_v56  ;;  %v451_v11 = vadd.f32 %v450_v17, %v449_v57  ;;  %v557_v37 = vpop.permute.xlu1 %556  ;;  %v430_v12 = vadd.f32 %v429_v10, %v428_v30  ;;  %v444_v13 = vadd.f32 %v443_v9, %v442_v63  ;;  %v555_v44 = vpop.permute.xlu0 %554  ;;  %v628_v4 = vld [vmem:[#allocation2 + $0x288] sm:$0xff] }
  0xc0   : > { %v579_v35 = vmul.f32 %v557_v37, %v531_v60  ;;  %v636_v17 = vld [vmem:[#allocation2 + $0x2c8] sm:$0xff] }
  0xc1   : > { %v453_v16 = vadd.f32 %v437_v6, %v364_v61  ;;  %v455_v20 = vadd.f32 %v451_v11, %v366_v1  ;;  %v452_v26 = vadd.f32 %v430_v12, %v1711_v54  ;;  %v454_v27 = vadd.f32 %v444_v13, %v1714_v55  ;;  %v541_v55 = vld [vmem:[#allocation2 + $0x258] sm:$0xff]  ;;  %v539_v61 = vld [vmem:[#allocation2 + $0x248] sm:$0xff]  ;;  %v538_v1 = vld [vmem:[#allocation2 + $0x240] sm:$0xff] }
  0xc2   : > { %v755_v54 = vmul.f32 %v739_v24, %v1684_v52  ;;  %v587_v52 = vmul.f32 %v557_v37, %v539_v61  ;;  %v586_v5 = vmul.f32 %v555_v44, %v538_v1  ;;  %v601_v30 = vsel %vm237_vm0, %v579_v35, 0.0  ;;  %v627_v37 = vld [vmem:[#allocation2 + $0x280] sm:$0xff]  ;;  %v545_v1 = vld [vmem:[#allocation2 + $0x278] sm:$0xff] }
  0xc3   : > { %v561_v29 = vpop.permute.xlu1 %560  ;;  %v1739_v31 = vadd.f32 %v1538_v21, %v453_v16  ;;  %v1742_v3 = vadd.f32 %v1540_v22, %v455_v20  ;;  %v559_v33 = vpop.permute.xlu0 %558  ;;  %v1745_v38 = vadd.f32 %v1563_v41, %v452_v26  ;;  %v1748_v45 = vadd.f32 %v1565_v42, %v454_v27  ;;  %v530_v21 = vld [vmem:[#allocation2 + $0x200] sm:$0xff]  ;;  %v540_v22 = vld [vmem:[#allocation2 + $0x250] sm:$0xff]  ;;  %v535_v41 = vld [vmem:[#allocation2 + $0x228] sm:$0xff] }
  0xc4   : > { %v581_v8 = vmul.f32 %v561_v29, %v533_v53  ;;  %v589_v14 = vmul.f32 %v561_v29, %v541_v55  ;;  %v768_v42 = vsel %vm237_vm0, %v747_v46, 0.0  ;;  %v782_v36 = vsel %vm237_vm0, %v755_v54, 0.0  ;;  %v630_v16 = vld [vmem:[#allocation2 + $0x298] sm:$0xff]  ;;  %v637_v46 = vld [vmem:[#allocation2 + $0x2d0] sm:$0xff] }
  0xc5   : > { %v578_v25 = vmul.f32 %v555_v44, %v530_v21  ;;  %v580_v39 = vmul.f32 %v559_v33, %v532_v2  ;;  %v588_v40 = vmul.f32 %v559_v33, %v540_v22  ;;  %v1757_v58 = vadd.f32 %v768_v42, %v1604_v18  ;;  %v635_v18 = vld [vmem:[#allocation2 + $0x2c0] sm:$0xff]  ;;  %v638_v20 = vld [vmem:[#allocation2 + $0x2d8] sm:$0xff]  ;;  %v629_v33 = vld [vmem:[#allocation2 + $0x290] sm:$0xff] }
  0xc6   : > { %v602_v50 = vsel %vm237_vm0, %v581_v8, 0.0  ;;  %v616_v51 = vsel %vm237_vm0, %v589_v14, 0.0  ;;  %v1760_v62 = vadd.f32 %v782_v36, %v1606_v19  ;;  %v615_v63 = vsel %vm237_vm0, %v587_v52, 0.0  ;;  %v537_v21 = vld [vmem:[#allocation2 + $0x238] sm:$0xff]  ;;  %v536_v14 = vld [vmem:[#allocation2 + $0x230] sm:$0xff] }
  0xc7   : > { %v565_v7 = vpop.permute.xlu1 %564  ;;  %v563_v34 = vpop.permute.xlu0 %562  ;;  %v594_v6 = vsel %vm237_vm0, %v578_v25, 0.0  ;;  %v608_v11 = vsel %vm237_vm0, %v586_v5, 0.0  ;;  %v595_v10 = vsel %vm237_vm0, %v580_v39, 0.0  ;;  %v609_v9 = vsel %vm237_vm0, %v588_v40, 0.0 }
  0xc8   : > { %v583_v32 = vmul.f32 %v565_v7, %v535_v41  ;;  %v591_v48 = vmul.f32 %v565_v7, %v543_v28  ;;  %v582_v0 = vmul.f32 %v563_v34, %v534_v43  ;;  %v590_v56 = vmul.f32 %v563_v34, %v542_v15  ;;  %v544_v41 = vld [vmem:[#allocation2 + $0x270] sm:$0xff] }
  0xc9   : > { %v603_v12 = vadd.f32 %v602_v50, %v601_v30  ;;  %v617_v13 = vadd.f32 %v616_v51, %v615_v63  ;;  %v596_v53 = vadd.f32 %v595_v10, %v594_v6  ;;  %v610_v55 = vadd.f32 %v609_v9, %v608_v11  ;;  %v640_v50 = vld [vmem:[#allocation2 + $0x2e8] sm:$0xff]  ;;  %v631_v30 = vld [vmem:[#allocation2 + $0x2a0] sm:$0xff] }
  0xca   : > { %v604_v19 = vsel %vm237_vm0, %v583_v32, 0.0  ;;  %v618_v44 = vsel %vm237_vm0, %v591_v48, 0.0  ;;  %v597_v24 = vsel %vm237_vm0, %v582_v0, 0.0  ;;  %v611_v26 = vsel %vm237_vm0, %v590_v56, 0.0  ;;  %v639_v63 = vld [vmem:[#allocation2 + $0x2e0] sm:$0xff] }
  0xcb   : > { %v646_v49 = vpop.permute.xlu1 %645  ;;  %v644_v57 = vpop.permute.xlu0 %643  ;;  %v605_v2 = vadd.f32 %v604_v19, %v603_v12  ;;  %v619_v22 = vadd.f32 %v618_v44, %v617_v13  ;;  %v598_v28 = vadd.f32 %v597_v24, %v596_v53  ;;  %v612_v34 = vadd.f32 %v611_v26, %v610_v55  ;;  %v642_v24 = vld [vmem:[#allocation2 + $0x2f8] sm:$0xff] }
  0xcc   : > { %v668_v27 = vmul.f32 %v646_v49, %v628_v4  ;;  %v676_v29 = vmul.f32 %v646_v49, %v636_v17  ;;  %v667_v60 = vmul.f32 %v644_v57, %v627_v37  ;;  %v675_v61 = vmul.f32 %v644_v57, %v635_v18  ;;  %v632_v49 = vld [vmem:[#allocation2 + $0x2a8] sm:$0xff] }
  0xce   : > { %v690_v52 = vsel %vm237_vm0, %v668_v27, 0.0  ;;  %v704_v43 = vsel %vm237_vm0, %v676_v29, 0.0  ;;  %v683_v39 = vsel %vm237_vm0, %v667_v60, 0.0  ;;  %v697_v40 = vsel %vm237_vm0, %v675_v61, 0.0 }
  0xcf   : > { %v650_v23 = vpop.permute.xlu1 %649  ;;  %v648_v54 = vpop.permute.xlu0 %647 }
  0xd0   : > { %v670_v7 = vmul.f32 %v650_v23, %v630_v16  ;;  %v678_v8 = vmul.f32 %v650_v23, %v638_v20  ;;  %v669_v42 = vmul.f32 %v648_v54, %v629_v33  ;;  %v677_v36 = vmul.f32 %v648_v54, %v637_v46  ;;  %v634_v23 = vld [vmem:[#allocation2 + $0x2b8] sm:$0xff]  ;;  %v633_v46 = vld [vmem:[#allocation2 + $0x2b0] sm:$0xff] }
  0xd1   : > { %v641_v54 = vld [vmem:[#allocation2 + $0x2f0] sm:$0xff] }
  0xd2   : > { %v691_v51 = vsel %vm237_vm0, %v670_v7, 0.0  ;;  %v705_v0 = vsel %vm237_vm0, %v678_v8, 0.0  ;;  %v684_v4 = vsel %vm237_vm0, %v669_v42, 0.0  ;;  %v698_v17 = vsel %vm237_vm0, %v677_v36, 0.0 }
  0xd3   : > { %v569_v35 = vpop.permute.xlu1 %568  ;;  %v567_v5 = vpop.permute.xlu0 %566  ;;  %v692_v19 = vadd.f32 %v691_v51, %v690_v52  ;;  %v706_v44 = vadd.f32 %v705_v0, %v704_v43  ;;  %v685_v26 = vadd.f32 %v684_v4, %v683_v39  ;;  %v699_v27 = vadd.f32 %v698_v17, %v697_v40  ;;  %v800_v17 = vld [vmem:[#allocation2 + $0x3d8] sm:$0xff] }
  0xd4   : > { %v585_v15 = vmul.f32 %v569_v35, %v537_v21  ;;  %v593_v25 = vmul.f32 %v569_v35, %v545_v1  ;;  %v584_v32 = vmul.f32 %v567_v5, %v536_v14  ;;  %v592_v48 = vmul.f32 %v567_v5, %v544_v41 }
  0xd6   : > { %v606_v56 = vsel %vm237_vm0, %v585_v15, 0.0  ;;  %v620_v57 = vsel %vm237_vm0, %v593_v25, 0.0  ;;  %v599_v9 = vsel %vm237_vm0, %v584_v32, 0.0  ;;  %v613_v37 = vsel %vm237_vm0, %v592_v48, 0.0 }
  0xd7   : > { %v607_v6 = vadd.f32 %v606_v56, %v605_v2  ;;  %v621_v11 = vadd.f32 %v620_v57, %v619_v22  ;;  %v654_v10 = vpop.permute.xlu1 %653  ;;  %v652_v13 = vpop.permute.xlu0 %651  ;;  %v600_v53 = vadd.f32 %v599_v9, %v598_v28  ;;  %v614_v55 = vadd.f32 %v613_v37, %v612_v34  ;;  %v797_v9 = vld [vmem:[#allocation2 + $0x3c0] sm:$0xff]  ;;  %v791_v37 = vld [vmem:[#allocation2 + $0x390] sm:$0xff] }
  0xd8   : > { %v672_v18 = vmul.f32 %v654_v10, %v632_v49  ;;  %v680_v12 = vmul.f32 %v654_v10, %v640_v50  ;;  %v671_v16 = vmul.f32 %v652_v13, %v631_v30  ;;  %v679_v20 = vmul.f32 %v652_v13, %v639_v63  ;;  %v789_v10 = vld [vmem:[#allocation2 + $0x380] sm:$0xff] }
  0xd9   : > { %v623_v1 = vadd.f32 %v607_v6, %v1739_v31  ;;  %v625_v2 = vadd.f32 %v621_v11, %v1742_v3  ;;  %v622_v5 = vadd.f32 %v600_v53, %v1745_v38  ;;  %v624_v39 = vadd.f32 %v614_v55, %v1748_v45  ;;  %v792_v45 = vld [vmem:[#allocation2 + $0x398] sm:$0xff]  ;;  %v790_v6 = vld [vmem:[#allocation2 + $0x388] sm:$0xff] }
  0xda   : > { %v693_v29 = vsel %vm237_vm0, %v672_v18, 0.0  ;;  %v707_v33 = vsel %vm237_vm0, %v680_v12, 0.0  ;;  %v686_v60 = vsel %vm237_vm0, %v671_v16, 0.0  ;;  %v700_v61 = vsel %vm237_vm0, %v679_v20, 0.0  ;;  %v798_v11 = vld [vmem:[#allocation2 + $0x3c8] sm:$0xff]  ;;  %v799_v18 = vld [vmem:[#allocation2 + $0x3d0] sm:$0xff] }
  0xdb   : > { %v658_v21 = vpop.permute.xlu1 %657  ;;  %v656_v8 = vpop.permute.xlu0 %655  ;;  %v694_v14 = vadd.f32 %v693_v29, %v692_v19  ;;  %v708_v41 = vadd.f32 %v707_v33, %v706_v44  ;;  %v687_v35 = vadd.f32 %v686_v60, %v685_v26  ;;  %v701_v52 = vadd.f32 %v700_v61, %v699_v27  ;;  %v802_v19 = vld [vmem:[#allocation2 + $0x3e8] sm:$0xff]  ;;  %v793_v20 = vld [vmem:[#allocation2 + $0x3a0] sm:$0xff] }
  0xdc   : > { %v674_v22 = vmul.f32 %v658_v21, %v634_v23  ;;  %v682_v7 = vmul.f32 %v658_v21, %v642_v24  ;;  %v673_v42 = vmul.f32 %v656_v8, %v633_v46  ;;  %v681_v36 = vmul.f32 %v656_v8, %v641_v54  ;;  %v801_v23 = vld [vmem:[#allocation2 + $0x3e0] sm:$0xff] }
  0xde   : > { %v695_v28 = vsel %vm237_vm0, %v674_v22, 0.0  ;;  %v709_v34 = vsel %vm237_vm0, %v682_v7, 0.0  ;;  %v688_v25 = vsel %vm237_vm0, %v673_v42, 0.0  ;;  %v702_v31 = vsel %vm237_vm0, %v681_v36, 0.0  ;;  %v895_v22 = vld [vmem:[#allocation2 + $0x448] sm:$0xff]  ;;  %v886_v42 = vld [vmem:[#allocation2 + $0x400] sm:$0xff] }
  0xdf   : > { %v696_v43 = vadd.f32 %v695_v28, %v694_v14  ;;  %v710_v15 = vadd.f32 %v709_v34, %v708_v41  ;;  %v816_v3 = vpop.permute.xlu1 %815  ;;  %v689_v40 = vadd.f32 %v688_v25, %v687_v35  ;;  %v703_v32 = vadd.f32 %v702_v31, %v701_v52  ;;  %v814_v48 = vpop.permute.xlu0 %813  ;;  %v894_v36 = vld [vmem:[#allocation2 + $0x440] sm:$0xff] }
  0xe0   : > { %v838_v16 = vmul.f32 %v816_v3, %v790_v6  ;;  %v845_v24 = vmul.f32 %v814_v48, %v797_v9  ;;  %v803_v9 = vld [vmem:[#allocation2 + $0x3f0] sm:$0xff] }
  0xe1   : > { %v712_v49 = vadd.f32 %v696_v43, %v623_v1  ;;  %v714_v50 = vadd.f32 %v710_v15, %v625_v2  ;;  %v711_v51 = vadd.f32 %v689_v40, %v622_v5  ;;  %v713_v0 = vadd.f32 %v703_v32, %v624_v39  ;;  %v887_v2 = vld [vmem:[#allocation2 + $0x408] sm:$0xff]  ;;  %v889_v43 = vld [vmem:[#allocation2 + $0x418] sm:$0xff]  ;;  %v888_v40 = vld [vmem:[#allocation2 + $0x410] sm:$0xff] }
  0xe2   : > { %v860_v21 = vsel %vm237_vm0, %v838_v16, 0.0  ;;  %v867_v8 = vsel %vm237_vm0, %v845_v24, 0.0  ;;  %v897_v15 = vld [vmem:[#allocation2 + $0x458] sm:$0xff]  ;;  %v896_v32 = vld [vmem:[#allocation2 + $0x450] sm:$0xff] }
  0xe3   : > { %v820_v56 = vpop.permute.xlu1 %819  ;;  %v1797_v57 = vadd.f32 %v1757_v58, %v712_v49  ;;  %v1800_v30 = vadd.f32 %v1760_v62, %v714_v50  ;;  %v818_v63 = vpop.permute.xlu0 %817  ;;  %v1803_v4 = vadd.f32 %v1631_v47, %v711_v51  ;;  %v1806_v38 = vadd.f32 %v1633_v59, %v713_v0  ;;  %v794_v62 = vld [vmem:[#allocation2 + $0x3a8] sm:$0xff] }
  0xe4   : > { %v840_v12 = vmul.f32 %v820_v56, %v792_v45  ;;  %v848_v13 = vmul.f32 %v820_v56, %v800_v17  ;;  %v846_v47 = vmul.f32 %v816_v3, %v798_v11  ;;  %v837_v59 = vmul.f32 %v814_v48, %v789_v10  ;;  %v796_v56 = vld [vmem:[#allocation2 + $0x3b8] sm:$0xff]  ;;  %v795_v10 = vld [vmem:[#allocation2 + $0x3b0] sm:$0xff] }
  0xe5   : > { %v839_v26 = vmul.f32 %v818_v63, %v791_v37  ;;  %v847_v27 = vmul.f32 %v818_v63, %v799_v18  ;;  %v804_v63 = vld [vmem:[#allocation2 + $0x3f8] sm:$0xff] }
  0xe6   : > { %v861_v54 = vsel %vm237_vm0, %v840_v12, 0.0  ;;  %v875_v53 = vsel %vm237_vm0, %v848_v13, 0.0  ;;  %v874_v1 = vsel %vm237_vm0, %v846_v47, 0.0  ;;  %v853_v7 = vsel %vm237_vm0, %v837_v59, 0.0 }
  0xe7   : > { %v824_v58 = vpop.permute.xlu1 %823  ;;  %v822_v44 = vpop.permute.xlu0 %821  ;;  %v854_v14 = vsel %vm237_vm0, %v839_v26, 0.0  ;;  %v868_v41 = vsel %vm237_vm0, %v847_v27, 0.0  ;;  %v862_v35 = vadd.f32 %v861_v54, %v860_v21  ;;  %v876_v52 = vadd.f32 %v875_v53, %v874_v1  ;;  %v891_v26 = vld [vmem:[#allocation2 + $0x428] sm:$0xff]  ;;  %v890_v53 = vld [vmem:[#allocation2 + $0x420] sm:$0xff] }
  0xe8   : > { %v842_v29 = vmul.f32 %v824_v58, %v794_v62  ;;  %v850_v33 = vmul.f32 %v824_v58, %v802_v19  ;;  %v841_v55 = vmul.f32 %v822_v44, %v793_v20  ;;  %v849_v60 = vmul.f32 %v822_v44, %v801_v23  ;;  %v899_v27 = vld [vmem:[#allocation2 + $0x468] sm:$0xff] }
  0xe9   : > { %v855_v49 = vadd.f32 %v854_v14, %v853_v7  ;;  %v869_v50 = vadd.f32 %v868_v41, %v867_v8 }
  0xea   : > { %v863_v28 = vsel %vm237_vm0, %v842_v29, 0.0  ;;  %v877_v34 = vsel %vm237_vm0, %v850_v33, 0.0  ;;  %v856_v31 = vsel %vm237_vm0, %v841_v55, 0.0  ;;  %v870_v3 = vsel %vm237_vm0, %v849_v60, 0.0  ;;  %v898_v55 = vld [vmem:[#allocation2 + $0x460] sm:$0xff] }
  0xeb   : > { %v905_v46 = vpop.permute.xlu1 %904  ;;  %v903_v61 = vpop.permute.xlu0 %902  ;;  %v864_v45 = vadd.f32 %v863_v28, %v862_v35  ;;  %v878_v17 = vadd.f32 %v877_v34, %v876_v52  ;;  %v857_v37 = vadd.f32 %v856_v31, %v855_v49  ;;  %v871_v18 = vadd.f32 %v870_v3, %v869_v50  ;;  %v893_v28 = vld [vmem:[#allocation2 + $0x438] sm:$0xff]  ;;  %v892_v3 = vld [vmem:[#allocation2 + $0x430] sm:$0xff] }
  0xec   : > { %v927_v5 = vmul.f32 %v905_v46, %v887_v2  ;;  %v935_v39 = vmul.f32 %v905_v46, %v895_v22  ;;  %v926_v51 = vmul.f32 %v903_v61, %v886_v42  ;;  %v934_v0 = vmul.f32 %v903_v61, %v894_v36  ;;  %v901_v34 = vld [vmem:[#allocation2 + $0x478] sm:$0xff] }
  0xee   : > { %v949_v62 = vsel %vm237_vm0, %v927_v5, 0.0  ;;  %v963_v19 = vsel %vm237_vm0, %v935_v39, 0.0  ;;  %v942_v20 = vsel %vm237_vm0, %v926_v51, 0.0  ;;  %v956_v23 = vsel %vm237_vm0, %v934_v0, 0.0  ;;  %v900_v5 = vld [vmem:[#allocation2 + $0x470] sm:$0xff] }
  0xef   : > { %v909_v25 = vpop.permute.xlu1 %908  ;;  %v907_v48 = vpop.permute.xlu0 %906 }
  0xf0   : > { %v929_v6 = vmul.f32 %v909_v25, %v889_v43  ;;  %v937_v11 = vmul.f32 %v909_v25, %v897_v15  ;;  %v928_v58 = vmul.f32 %v907_v48, %v888_v40  ;;  %v936_v12 = vmul.f32 %v907_v48, %v896_v32 }
  0xf2   : > { %v950_v29 = vsel %vm237_vm0, %v929_v6, 0.0  ;;  %v964_v33 = vsel %vm237_vm0, %v937_v11, 0.0  ;;  %v943_v60 = vsel %vm237_vm0, %v928_v58, 0.0  ;;  %v957_v61 = vsel %vm237_vm0, %v936_v12, 0.0 }
  0xf3   : > { %v828_v13 = vpop.permute.xlu1 %827  ;;  %v826_v47 = vpop.permute.xlu0 %825  ;;  %v951_v42 = vadd.f32 %v950_v29, %v949_v62  ;;  %v965_v36 = vadd.f32 %v964_v33, %v963_v19  ;;  %v944_v43 = vadd.f32 %v943_v60, %v942_v20  ;;  %v958_v15 = vadd.f32 %v957_v61, %v956_v23 }
  0xf4   : > { %v844_v44 = vmul.f32 %v828_v13, %v796_v56  ;;  %v852_v16 = vmul.f32 %v828_v13, %v804_v63  ;;  %v843_v59 = vmul.f32 %v826_v47, %v795_v10  ;;  %v851_v24 = vmul.f32 %v826_v47, %v803_v9 }
  0xf6   : > { %v865_v46 = vsel %vm237_vm0, %v844_v44, 0.0  ;;  %v879_v54 = vsel %vm237_vm0, %v852_v16, 0.0  ;;  %v858_v22 = vsel %vm237_vm0, %v843_v59, 0.0  ;;  %v872_v7 = vsel %vm237_vm0, %v851_v24, 0.0 }
  0xf7   : > { %v866_v21 = vadd.f32 %v865_v46, %v864_v45  ;;  %v880_v1 = vadd.f32 %v879_v54, %v878_v17  ;;  %v913_v2 = vpop.permute.xlu1 %912  ;;  %v911_v41 = vpop.permute.xlu0 %910  ;;  %v859_v39 = vadd.f32 %v858_v22, %v857_v37  ;;  %v873_v40 = vadd.f32 %v872_v7, %v871_v18 }
  0xf8   : > { %v931_v8 = vmul.f32 %v913_v2, %v891_v26  ;;  %v939_v14 = vmul.f32 %v913_v2, %v899_v27  ;;  %v930_v35 = vmul.f32 %v911_v41, %v890_v53  ;;  %v938_v52 = vmul.f32 %v911_v41, %v898_v55 }
  0xf9   : > { %v882_v50 = vadd.f32 %v866_v21, %v1797_v57  ;;  %v884_v51 = vadd.f32 %v880_v1, %v1800_v30  ;;  %v881_v13 = vadd.f32 %v859_v39, %v1803_v4  ;;  %v883_v62 = vadd.f32 %v873_v40, %v1806_v38 }
  0xfa   : > { %v952_v25 = vsel %vm237_vm0, %v931_v8, 0.0  ;;  %v966_v31 = vsel %vm237_vm0, %v939_v14, 0.0  ;;  %v945_v32 = vsel %vm237_vm0, %v930_v35, 0.0  ;;  %v959_v48 = vsel %vm237_vm0, %v938_v52, 0.0 }
  0xfb   : > { %v917_v49 = vpop.permute.xlu1 %916  ;;  %v915_v63 = vpop.permute.xlu0 %914  ;;  %v953_v45 = vadd.f32 %v952_v25, %v951_v42  ;;  %v967_v17 = vadd.f32 %v966_v31, %v965_v36  ;;  %v946_v10 = vadd.f32 %v945_v32, %v944_v43  ;;  %v960_v9 = vadd.f32 %v959_v48, %v958_v15 }
  0xfc   : > { %v933_v0 = vmul.f32 %v917_v49, %v893_v28  ;;  %v941_v56 = vmul.f32 %v917_v49, %v901_v34  ;;  %v932_v6 = vmul.f32 %v915_v63, %v892_v3  ;;  %v940_v11 = vmul.f32 %v915_v63, %v900_v5 }
  0xfe   : > { %v954_v37 = vsel %vm237_vm0, %v933_v0, 0.0  ;;  %v968_v18 = vsel %vm237_vm0, %v941_v56, 0.0  ;;  %v947_v30 = vsel %vm237_vm0, %v932_v6, 0.0  ;;  %v961_v12 = vsel %vm237_vm0, %v940_v11, 0.0 }
  0xff   : > { %v955_v58 = vadd.f32 %v954_v37, %v953_v45  ;;  %v969_v57 = vadd.f32 %v968_v18, %v967_v17  ;;  %v948_v19 = vadd.f32 %v947_v30, %v946_v10  ;;  %v962_v44 = vadd.f32 %v961_v12, %v960_v9 }
 0x101   : > { %v971_v16 = vadd.f32 %v955_v58, %v882_v50  ;;  %v973_v47 = vadd.f32 %v969_v57, %v884_v51  ;;  %v970_v20 = vadd.f32 %v948_v19, %v881_v13  ;;  %v972_v23 = vadd.f32 %v962_v44, %v883_v62 }
 0x103   : > { %975 = vst.msk [vmem:[%s187_s24 + $0x8] sm:$0xff] %vm237_vm0, %v971_v16  ;;  %977 = vst.msk [vmem:[%s187_s24 + $0x18] sm:$0xff] %vm237_vm0, %v973_v47 }
 0x104   : > { %974 = vst.msk [vmem:[%s187_s24] sm:$0xff] %vm237_vm0, %v970_v20  ;;  %976 = vst.msk [vmem:[%s187_s24 + $0x10] sm:$0xff] %vm237_vm0, %v972_v23 }
 0x105   : > { %1219 = shalt.err (!%p1216_p3)
}
 0x106   : > { %s1220_s5 = scalar_lea.hbm %s1854_s27, 512  ;;  %s1224_s8 = scalar_lea.hbm %s1911_s2, 1024 }
 0x107   : > { %p1221_p5 = scmp.ne.s32.totalorder %s1854_s27, %s1220_s5  ;;  %p1225_p9 = scmp.lt.s32.totalorder %s1854_s27, %s1911_s2 }
 0x108   : > { %p1226_p12 = scmp.lt.s32.totalorder %s1224_s8, %s1220_s5 }
 0x109   : > { %p1222_p6 = pnand %p1221_p5, %p1351_p4 }
 0x10a   : > { %p1227_p10 = por %p1226_p12, %p1225_p9 }
 0x10b   : > { %p1223_p7 = pneg %p1222_p6 }
 0x10d   : > { %p1228_p11 = pnand %p1227_p10, %p1223_p7 }
 0x10f   : > { %1231 = shalt.err (!%p1228_p11)
}
 0x110   : > { %s1294_s18 = smov 128   ;;  %s1295_s20 = smov 8  }
 0x111   : > { %1112 = dma.vmem_to_hbm [thread:$0]  (%p1351_p4), %s1856_s25, 512, %s1854_s27, %s1864_s28, %s1294_s18, %s1294_s18, %s1295_s20  }
 0x112 PF: > { %p1124_p13 = scmp.ge.s32.totalorder %s1286_s14, 2  ;;  %s1012_s23 = sand.u32 1, %s1266_s9  }
 0x113   : > { %s1013_s24 = scalar_lea.sflag [#allocation4], %s1012_s23 }
 0x114   : > { %p1119_p0 = pnand %p1124_p13, %p1358_p8 }
 0x116   : > { %p1120_p1 = pneg %p1119_p0 }
 0x118   : > { %1261 = dma.done.wait (%p1120_p1), %s1013_s24, 512  }
 0x119   : > { %1263 = vsyncadd (%p1120_p1), %s1013_s24, 4294966784  ;;  %s16_s14 = sadd.s32 1, %s1286_s14   ;;  %s1916_s9 = smov %s1270_s10 }
 0x11a   : > { %p13_p2 = scmp.ge.s32.totalorder %s16_s14, 4   ;;  %s1917_s10 = smov %s1274_s11 }
 0x11b   : > { %s1918_s11 = smov %s1364_s22  ;;  %s1919_s12 = smov %s1282_s13 }
 0x11c   : > { %s1920_s13 = smov %s1922_s17  ;;  %15 = sbr.rel (!%p13_p2) target bundleno = 5 (0x5), region = 77 }
 0x121   :  { %1018 = vsyncpa [#allocation3], 1 }
 0x122   :  { %1020 = vsyncpa [#allocation3 + $0x1], 1 }
 0x123   :  { %1021 = vsyncpa [#allocation4], 1 }
 0x124   :  { %1023 = vsyncpa [#allocation4 + $0x1], 1 }

</bundles_post_ra>
